<compile_context>
chip_gen: v7x
topology: tpu7x:2x2x1
jax: 0.10.0
libtpu: 0.0.40
codegen_flags: <defaults>
</compile_context>

<pallas_src>
import jax
import jax.numpy as jnp
import numpy as np
from jax.experimental import pallas as pl
from jax.experimental.pallas import tpu as pltpu


_LANE = 128
_SUBLANE = 8
# Safe scoped-VMEM budget across generations (v7x physical VMEM is 64 MiB).
_VMEM_BUDGET_BYTES = 48 * 1024 * 1024


def _round_up(x, m):
    return ((x + m - 1) // m) * m


def _fused_depth_kernel(x_ref, wf_ref, bf_ref, wg_ref, bg_ref, o_ref, acc_ref):
    """One grid step = one (f, g) residual pair applied to one row tile.

    grid = (num_row_tiles, depth). Depth is the inner ("arbitrary") axis, so
    the activation tile lives in the f32 VMEM scratch accumulator for all
    `depth` layers; the output is written back only after the last layer.
    """
    d = pl.program_id(1)

    @pl.when(d == 0)
    def _():
        acc_ref[...] = x_ref[...].astype(jnp.float32)

    x = acc_ref[...]  # f32 residual accumulator

    # x = x + f(x): feed MXU in the native parameter dtype, accumulate in f32.
    f_out = jnp.dot(x.astype(wf_ref.dtype), wf_ref[...],
                    preferred_element_type=jnp.float32)
    y = x + f_out + bf_ref[...].astype(jnp.float32)

    # x = x + g(x)
    g_out = jnp.dot(y.astype(wg_ref.dtype), wg_ref[...],
                    preferred_element_type=jnp.float32)
    acc_ref[...] = y + g_out + bg_ref[...].astype(jnp.float32)

    @pl.when(d == pl.num_programs(1) - 1)
    def _():
        o_ref[...] = acc_ref[...].astype(o_ref.dtype)


def _choose_tile_rows(rows, dim_p, act_itemsize, w_itemsize):
    """Pick a row tile: multiple of 8, >=2 tiles when possible, fits VMEM."""
    # Per-depth weight working set (Wf + Wg + biases), double-buffered.
    weight_bytes = 2 * (2 * dim_p * dim_p + 2 * dim_p) * w_itemsize

    tile = 512
    # Keep at least 2 row tiles so the "parallel" row axis can be sharded
    # across the two v7x TensorCores (and gives pipelining on all chips).
    if rows > _SUBLANE:
        tile = min(tile, _round_up(-(-rows // 2), _SUBLANE))
    tile = max(tile, _SUBLANE)

    def fits(t):
        act_bytes = t * dim_p * (2 * act_itemsize      # x tile (double-buffered)
                                 + 2 * act_itemsize    # out tile (double-buffered)
                                 + 4)                  # f32 accumulator scratch
        return act_bytes + weight_bytes <= _VMEM_BUDGET_BYTES

    while tile > _SUBLANE and not fits(tile):
        tile = max(_SUBLANE, (tile // 2 // _SUBLANE) * _SUBLANE)
    # TODO(synk): for very large dim (weights alone > budget), tile the weight
    # N dimension as a third grid axis instead of shrinking rows further.
    return tile


def sequential_sequence_forward(x, layer_params, **kwargs):
    """Pallas implementation of SequentialSequence.forward.

    x: (batch, seq, dim)
    layer_params: list of (Wf, bf, Wg, bg); Wf/Wg: (dim, dim), bf/bg: (1, dim).
    """
    # route_args equivalent: with empty args_route / no routed kwargs, every
    # layer receives empty f_args / g_args — nothing to route.
    del kwargs
    # TODO(synk): layer_dropout and kwarg routing to arbitrary f/g submodules
    # are not representable for generic callables; forward semantics here
    # match the no-kwargs, no-dropout path of the reference module.

    batch, seq, dim = x.shape
    depth = len(layer_params)
    rows = batch * seq

    # Lane-dense layout: pad dim to a multiple of 128 (zero padding is exact).
    dim_p = _round_up(dim, _LANE)
    pad_d = dim_p - dim

    wf_all = jnp.stack([p[0] for p in layer_params])   # (depth, dim, dim)
    bf_all = jnp.stack([p[1] for p in layer_params])   # (depth, 1, dim)
    wg_all = jnp.stack([p[2] for p in layer_params])
    bg_all = jnp.stack([p[3] for p in layer_params])
    if pad_d:
        wf_all = jnp.pad(wf_all, ((0, 0), (0, pad_d), (0, pad_d)))
        wg_all = jnp.pad(wg_all, ((0, 0), (0, pad_d), (0, pad_d)))
        bf_all = jnp.pad(bf_all, ((0, 0), (0, 0), (0, pad_d)))
        bg_all = jnp.pad(bg_all, ((0, 0), (0, 0), (0, pad_d)))

    tile_rows = _choose_tile_rows(rows, dim_p,
                                  jnp.dtype(x.dtype).itemsize,
                                  jnp.dtype(wf_all.dtype).itemsize)
    rows_p = _round_up(rows, tile_rows)

    x2d = x.reshape(rows, dim)
    if rows_p != rows or pad_d:
        x2d = jnp.pad(x2d, ((0, rows_p - rows), (0, pad_d)))

    grid = (rows_p // tile_rows, depth)

    out = pl.pallas_call(
        _fused_depth_kernel,
        out_shape=jax.ShapeDtypeStruct((rows_p, dim_p), x.dtype),
        grid_spec=pltpu.PrefetchScalarGridSpec(
            num_scalar_prefetch=0,
            grid=grid,
            in_specs=[
                pl.BlockSpec((tile_rows, dim_p), lambda i, d: (i, 0)),       # x
                pl.BlockSpec((None, dim_p, dim_p), lambda i, d: (d, 0, 0)),  # Wf
                pl.BlockSpec((None, 1, dim_p), lambda i, d: (d, 0, 0)),      # bf
                pl.BlockSpec((None, dim_p, dim_p), lambda i, d: (d, 0, 0)),  # Wg
                pl.BlockSpec((None, 1, dim_p), lambda i, d: (d, 0, 0)),      # bg
            ],
            out_specs=pl.BlockSpec((tile_rows, dim_p), lambda i, d: (i, 0)),
            scratch_shapes=[pltpu.VMEM((tile_rows, dim_p), jnp.float32)],
        ),
        compiler_params=pltpu.CompilerParams(
            dimension_semantics=("parallel", "arbitrary"),
            vmem_limit_bytes=_VMEM_BUDGET_BYTES,
        ),
    )(x2d, wf_all, bf_all, wg_all, bg_all)

    out = out[:rows, :dim]
    return out.reshape(batch, seq, dim)


def _reference_forward(x, layer_params):
    batch, seq, dim = x.shape
    x2d = x.reshape(batch * seq, dim).astype(jnp.float32)
    for (wf, bf, wg, bg) in layer_params:
        x2d = x2d + (x2d @ wf.astype(jnp.float32) + bf.astype(jnp.float32))
        x2d = x2d + (x2d @ wg.astype(jnp.float32) + bg.astype(jnp.float32))
    return x2d.astype(x.dtype).reshape(batch, seq, dim)


if __name__ == "__main__":
    key = jax.random.PRNGKey(0)
    batch, seq, dim = 2, 8, 32
    depth = 2  # number of (f, g) layer pairs

    k_x, k_w = jax.random.split(key)
    x = jax.random.normal(k_x, (batch, seq, dim), dtype=jnp.float32)

    # Deterministic layer parameters: depth x (Wf, bf, Wg, bg)
    layer_params = []
    wkeys = jax.random.split(k_w, depth * 4)
    for d in range(depth):
        wf = jax.random.normal(wkeys[4 * d + 0], (dim, dim), jnp.float32) * 0.02
        bf = jax.random.normal(wkeys[4 * d + 1], (1, dim), jnp.float32) * 0.02
        wg = jax.random.normal(wkeys[4 * d + 2], (dim, dim), jnp.float32) * 0.02
        bg = jax.random.normal(wkeys[4 * d + 3], (1, dim), jnp.float32) * 0.02
        layer_params.append((wf, bf, wg, bg))

    out = sequential_sequence_forward(x, layer_params)
    out = jax.block_until_ready(out)

    ref = _reference_forward(x, layer_params)
    np.testing.assert_allclose(np.asarray(out), np.asarray(ref),
                               rtol=1e-5, atol=1e-5)
    print("KERNEL_OK")
</pallas_src>

<mosaic_0001>
module attributes {stable_mosaic.version = 11 : i64} {
  func.func @_fused_depth_kernel(%arg0: i32, %arg1: i32, %arg2: memref<8x128xf32, #tpu.memory_space<vmem>>, %arg3: memref<1x128x128xf32, #tpu.memory_space<vmem>>, %arg4: memref<1x1x128xf32, #tpu.memory_space<vmem>>, %arg5: memref<1x128x128xf32, #tpu.memory_space<vmem>>, %arg6: memref<1x1x128xf32, #tpu.memory_space<vmem>>, %arg7: memref<8x128xf32, #tpu.memory_space<vmem>>, %arg8: memref<8x128xf32, #tpu.memory_space<vmem>>) attributes {dimension_semantics = [#tpu.dimension_semantics<parallel>, #tpu.dimension_semantics<arbitrary>], iteration_bounds = array<i64: 2, 2>, scalar_prefetch = 0 : i64, scratch_operands = 1 : i64, tpu.core_type = #tpu.core_type<tc>, window_params = [{transform_indices = @transform_0, window_bounds = array<i64: 8, 128>}, {transform_indices = @transform_1, window_bounds = array<i64: 1, 128, 128>}, {transform_indices = @transform_2, window_bounds = array<i64: 1, 1, 128>}, {transform_indices = @transform_3, window_bounds = array<i64: 1, 128, 128>}, {transform_indices = @transform_4, window_bounds = array<i64: 1, 1, 128>}, {transform_indices = @transform_5, window_bounds = array<i64: 8, 128>}]} {
    %c0_i32 = arith.constant 0 : i32
    %0 = arith.cmpi eq, %arg1, %c0_i32 : i32
    %1 = arith.extui %0 : i1 to i32
    %c0_i32_0 = arith.constant 0 : i32
    %2 = arith.cmpi ne, %1, %c0_i32_0 : i32
    scf.if %2 {
      %c0_18 = arith.constant 0 : index
      %c0_19 = arith.constant 0 : index
      %24 = vector.load %arg2[%c0_18, %c0_19] : memref<8x128xf32, #tpu.memory_space<vmem>>, vector<8x128xf32>
      %c0_20 = arith.constant 0 : index
      %c0_21 = arith.constant 0 : index
      %25 = vector.load %arg8[%c0_20, %c0_21] : memref<8x128xf32, #tpu.memory_space<vmem>>, vector<8x128xf32>
      tpu.vector_store %arg8[%c0_20, %c0_21], %24 {strides = array<i32>} : memref<8x128xf32, #tpu.memory_space<vmem>>, vector<8x128xf32>,
    } else {
    }
    %c0 = arith.constant 0 : index
    %c0_1 = arith.constant 0 : index
    %3 = vector.load %arg8[%c0, %c0_1] : memref<8x128xf32, #tpu.memory_space<vmem>>, vector<8x128xf32>
    %c0_2 = arith.constant 0 : index
    %c0_3 = arith.constant 0 : index
    %c0_4 = arith.constant 0 : index
    %4 = vector.load %arg3[%c0_2, %c0_3, %c0_4] : memref<1x128x128xf32, #tpu.memory_space<vmem>>, vector<1x128x128xf32>
    %5 = vector.shape_cast %4 : vector<1x128x128xf32> to vector<128x128xf32>
    %cst = arith.constant dense<0.000000e+00> : vector<8x128xf32>
    %6 = tpu.matmul %3, %5, %cst {dimension_numbers = #tpu.dot_dimension_numbers<[1], [0], [0], [1], [0, 0, 1, 1], [], []>} : vector<8x128xf32>, vector<128x128xf32>, vector<8x128xf32> -> vector<8x128xf32>
    %7 = arith.addf %3, %6 : vector<8x128xf32>
    %c0_5 = arith.constant 0 : index
    %c0_6 = arith.constant 0 : index
    %c0_7 = arith.constant 0 : index
    %8 = vector.load %arg4[%c0_5, %c0_6, %c0_7] : memref<1x1x128xf32, #tpu.memory_space<vmem>>, vector<1x1x128xf32>
    %9 = vector.shape_cast %8 : vector<1x1x128xf32> to vector<1x128xf32>
    %10 = vector.broadcast %9 : vector<1x128xf32> to vector<8x128xf32>
    %11 = arith.addf %7, %10 : vector<8x128xf32>
    %c0_8 = arith.constant 0 : index
    %c0_9 = arith.constant 0 : index
    %c0_10 = arith.constant 0 : index
    %12 = vector.load %arg5[%c0_8, %c0_9, %c0_10] : memref<1x128x128xf32, #tpu.memory_space<vmem>>, vector<1x128x128xf32>
    %13 = vector.shape_cast %12 : vector<1x128x128xf32> to vector<128x128xf32>
    %cst_11 = arith.constant dense<0.000000e+00> : vector<8x128xf32>
    %14 = tpu.matmul %11, %13, %cst_11 {dimension_numbers = #tpu.dot_dimension_numbers<[1], [0], [0], [1], [0, 0, 1, 1], [], []>} : vector<8x128xf32>, vector<128x128xf32>, vector<8x128xf32> -> vector<8x128xf32>
    %15 = arith.addf %11, %14 : vector<8x128xf32>
    %c0_12 = arith.constant 0 : index
    %c0_13 = arith.constant 0 : index
    %c0_14 = arith.constant 0 : index
    %16 = vector.load %arg6[%c0_12, %c0_13, %c0_14] : memref<1x1x128xf32, #tpu.memory_space<vmem>>, vector<1x1x128xf32>
    %17 = vector.shape_cast %16 : vector<1x1x128xf32> to vector<1x128xf32>
    %18 = vector.broadcast %17 : vector<1x128xf32> to vector<8x128xf32>
    %19 = arith.addf %15, %18 : vector<8x128xf32>
    %c0_15 = arith.constant 0 : index
    %c0_16 = arith.constant 0 : index
    %20 = vector.load %arg8[%c0_15, %c0_16] : memref<8x128xf32, #tpu.memory_space<vmem>>, vector<8x128xf32>
    tpu.vector_store %arg8[%c0_15, %c0_16], %19 {strides = array<i32>} : memref<8x128xf32, #tpu.memory_space<vmem>>, vector<8x128xf32>,
    %c1_i32 = arith.constant 1 : i32
    %21 = arith.cmpi eq, %arg1, %c1_i32 : i32
    %22 = arith.extui %21 : i1 to i32
    %c0_i32_17 = arith.constant 0 : i32
    %23 = arith.cmpi ne, %22, %c0_i32_17 : i32
    scf.if %23 {
      %c0_18 = arith.constant 0 : index
      %c0_19 = arith.constant 0 : index
      %24 = vector.load %arg8[%c0_18, %c0_19] : memref<8x128xf32, #tpu.memory_space<vmem>>, vector<8x128xf32>
      %c0_20 = arith.constant 0 : index
      %c0_21 = arith.constant 0 : index
      %25 = vector.load %arg7[%c0_20, %c0_21] : memref<8x128xf32, #tpu.memory_space<vmem>>, vector<8x128xf32>
      tpu.vector_store %arg7[%c0_20, %c0_21], %24 {strides = array<i32>} : memref<8x128xf32, #tpu.memory_space<vmem>>, vector<8x128xf32>,
    } else {
    }
    return
  }
  func.func @transform_0(%arg0: i32, %arg1: i32) -> (i32, i32) {
    %c0_i32 = arith.constant 0 : i32
    %c0_i32_0 = arith.constant 0 : i32
    return %arg0, %c0_i32 : i32, i32
  }
  func.func @transform_1(%arg0: i32, %arg1: i32) -> (i32, i32, i32) {
    %c0_i32 = arith.constant 0 : i32
    %c0_i32_0 = arith.constant 0 : i32
    %c0_i32_1 = arith.constant 0 : i32
    return %arg1, %c0_i32, %c0_i32_0 : i32, i32, i32
  }
  func.func @transform_2(%arg0: i32, %arg1: i32) -> (i32, i32, i32) {
    %c0_i32 = arith.constant 0 : i32
    %c0_i32_0 = arith.constant 0 : i32
    %c0_i32_1 = arith.constant 0 : i32
    return %arg1, %c0_i32, %c0_i32_0 : i32, i32, i32
  }
  func.func @transform_3(%arg0: i32, %arg1: i32) -> (i32, i32, i32) {
    %c0_i32 = arith.constant 0 : i32
    %c0_i32_0 = arith.constant 0 : i32
    %c0_i32_1 = arith.constant 0 : i32
    return %arg1, %c0_i32, %c0_i32_0 : i32, i32, i32
  }
  func.func @transform_4(%arg0: i32, %arg1: i32) -> (i32, i32, i32) {
    %c0_i32 = arith.constant 0 : i32
    %c0_i32_0 = arith.constant 0 : i32
    %c0_i32_1 = arith.constant 0 : i32
    return %arg1, %c0_i32, %c0_i32_0 : i32, i32, i32
  }
  func.func @transform_5(%arg0: i32, %arg1: i32) -> (i32, i32) {
    %c0_i32 = arith.constant 0 : i32
    %c0_i32_0 = arith.constant 0 : i32
    return %arg0, %c0_i32 : i32, i32
  }
}

</mosaic_0001>

<bundles_post_ra>
// kernel: tpu_custom_call.1
= control target key start
LH: loop header
LB: loop body
LE: loop exit
PB: predicated region body
PF: predicated region fallthrough
CT: control target
= control target key end

     0   :  { %s1696_s0 = inlined_call_operand.hbm [shape: f32[16,128], index: 0, kind: input, shape index: {}]   ;;  %s1697_s1 = inlined_call_operand.hbm [shape: f32[2,128,128], index: 1, kind: input, shape index: {}]   ;;  %s1698_s2 = inlined_call_operand.vmem [shape: f32[2,1,128], index: 2, kind: input, shape index: {}]   ;;  %s1699_s3 = inlined_call_operand.hbm [shape: f32[2,128,128], index: 3, kind: input, shape index: {}]   ;;  %s1700_s4 = inlined_call_operand.vmem [shape: f32[2,1,128], index: 4, kind: input, shape index: {}]   ;;  %s1701_s5 = inlined_call_operand.hbm [shape: f32[16,128], index: 5, kind: output, shape index: {}]  }
   0x1   :  { %1717 = sst [smem:[#allocation20_spill]] %s1697_s1 }
   0x2   :  { %1718 = sst [smem:[#allocation21_spill]] %s1700_s4 }
   0x3   :  { %1719 = sst [smem:[#allocation22_spill]] %s1701_s5 }
   0x4   :  { %10 = vsyncpa [#allocation4], 0 }
   0x5   :  { %12 = vsyncpa [#allocation4 + $0x1], 0 }
   0x6   :  { %13 = vsyncpa [#allocation7], 0 }
   0x7   :  { %15 = vsyncpa [#allocation7 + $0x1], 0 }
   0x8   :  { %16 = vsyncpa [#allocation5], 0 }
   0x9   :  { %18 = vsyncpa [#allocation5 + $0x1], 0  ;;  %s1270_s18 = smov 0   ;;  %s1272_s19 = smov 0  }
   0xa   :  { %s1274_s20 = smov 0   ;;  %s1276_s21 = smov 0  }
   0xb   :  { %s1278_s22 = smov 0   ;;  %s1280_s23 = smov 0  }
   0xc   :  { %s1282_s24 = smov 0   ;;  %s1284_s25 = smov 0  }
   0xd   :  { %s1286_s26 = smov 0   ;;  %s1288_s27 = smov 0  }
   0xe   :  { %s1290_s28 = smov 0  }
   0xf LB: > { %1720 = sst [smem:[#allocation13_spill]] %s1197_s20  ;;  %s33_s29 = sadd.s32 1, %s1221_s26  ;;  %s1229_s28 = sphi %s1290_s28, %s24_s28   ;;  %s1225_s27 = sphi %s1288_s27, %s1758_s27   ;;  %s1221_s26 = sphi %s1286_s26, %s1764_s26   ;;  %s1217_s25 = sphi %s1284_s25, %s1756_s25   ;;  %s1213_s24 = sphi %s1282_s24, %s1755_s24   ;;  %s1209_s23 = sphi %s1280_s23, %s1763_s23   ;;  %s1205_s22 = sphi %s1278_s22, %s1762_s22   ;;  %s1201_s21 = sphi %s1276_s21, %s1761_s21   ;;  %s1197_s20 = sphi %s1274_s20, %s1754_s20   ;;  %s1193_s19 = sphi %s1272_s19, %s1760_s19   ;;  %s1189_s18 = sphi %s1270_s18, %s1759_s18  }
  0x10   : > { %1721 = sst [smem:[#allocation14_spill]] %s1217_s25  ;;  %p1705_p0 = scmp.eq.s32.totalorder %s1229_s28, 0 }
  0x11   : > { %1722 = sst [smem:[#allocation15_spill]] %s1221_s26  ;;  %p1327_p1 = scmp.ge.s32.totalorder %s33_s29, 2 }
  0x12   : > { %1723 = sst [smem:[#allocation16_spill]] %s1225_s27  ;;  %s69_s6 = sadd.s32 1, %s1197_s20 }
  0x13   : > { %p76_p2 = scmp.ne.s32.totalorder %s1197_s20, %s1193_s19  ;;  %s1766_s29 = smov (%p1327_p1, %s33_s29), 0 }
  0x14   : > { %1725 = sst [smem:[#allocation17_spill]] %s1766_s29  ;;  %s66_s7 = ssub.s32 %s1221_s26, %s1766_s29 }
  0x15   : > { %p78_p3 = por %p76_p2, %p1705_p0  ;;  %p1704_p4 = scmp.lt.s32.totalorder %s1229_s28, 4 }
  0x16   : > { %p67_p5 = scmp.eq.s32.totalorder %s66_s7, 0  ;;  %s228_s8 = sand.u32 1, %s1229_s28  }
  0x17   : > { %s230_s9 = sand.u32 1, %s1197_s20   ;;  %s1702_s12 = sshll.u32 %s1221_s26, 11 }
  0x18   : > { %s1346_s10 = scalar_select %p67_p5, %s1197_s20, %s69_s6  }
  0x19   : > { %s1348_s11 = sshll.u32 %s230_s9, 7  ;;  %s1727_s1 = sld [smem:[#allocation20_spill]] }
  0x1a   : > { %1726 = sst [smem:[#allocation18_spill]] %s1346_s10  ;;  %s232_s16 = scalar_lea.vmem [#allocation6], %s1348_s11 }
  0x1b   : > { %s239_s17 = sshll.u32 %s232_s16, 4  ;;  %p1361_p6 = pnand %p1704_p4, %p78_p3  ;;  %s1365_s17 = int_to_ptr.vmem [resolvable:$true] %s239_s17 }
  0x1c   : > { %s1367_s7 = scalar_lea.sflag [#allocation7], %s228_s8 }
  0x1d   : > { %p1706_p8 = pneg %p1361_p6 }
  0x1f   : > { %s1356_s15 = scalar_lea.hbm %s1727_s1, %s1702_s12  ;;  %s1018_s16 = scalar_lea.hbm %s1727_s1, 4096 }
  0x20   : > { %s1013_s9 = scalar_lea.hbm %s1356_s15, 2048  ;;  %p1019_p11 = scmp.lt.u32.totalorder %s1356_s15, %s1727_s1 }
  0x21   : > { %p1014_p7 = scmp.ne.s32.totalorder %s1356_s15, %s1013_s9  ;;  %p1020_p12 = scmp.lt.u32.totalorder %s1018_s16, %s1013_s9 }
  0x22   : > { %p1022_p2 = scmp.lt.u32.totalorder %s1013_s9, %s1356_s15 }
  0x23   : > { %p1016_p9 = pnand %p1706_p8, %p1014_p7  ;;  %p1021_p13 = por %p1020_p12, %p1019_p11 }
  0x25   : > { %p1017_p10 = pneg %p1016_p9  ;;  %p1023_p3 = por %p1022_p2, %p1021_p13 }
  0x27   : > { %p1024_p5 = pnand %p1023_p3, %p1017_p10 }
  0x29   : > { %1027 = shalt.err (!%p1024_p5)
}
  0x2a   : > { %s1028_s8 = scalar_lea.vmem %s1365_s17, 2048  ;;  %s1231_s13 = smov [#allocation6]  }
  0x2b   : > { %p1029_p7 = scmp.ne.s32.totalorder %s1365_s17, %s1028_s8  ;;  %s1033_s14 = sshll.u32 %s1231_s13, 4  ;;  %s1034_s14 = int_to_ptr.vmem [resolvable:$false] %s1033_s14 }
  0x2c   : > { %s1035_s29 = scalar_lea.vmem %s1034_s14, 4096  ;;  %p1036_p0 = scmp.lt.s32.totalorder %s1365_s17, %s1034_s14 }
  0x2d   : > { %p1031_p9 = pnand %p1029_p7, %p1706_p8  ;;  %p1037_p11 = scmp.lt.s32.totalorder %s1035_s29, %s1028_s8 }
  0x2f   : > { %p1032_p4 = pneg %p1031_p9  ;;  %p1038_p12 = por %p1037_p11, %p1036_p0 }
  0x31   : > { %p1039_p13 = pnand %p1038_p12, %p1032_p4 }
  0x33   : > { %1042 = shalt.err (!%p1039_p13)
}
  0x34   : > { %s1707_s12 = smov 128   ;;  %s1708_s9 = smov 8  }
  0x35   : > { %910 = dma.hbm_to_vmem [thread:$0]  (!%p1361_p6), %s1356_s15, 2048, %s1365_s17, %s1367_s7, %s1707_s12, %s1707_s12, %s1708_s9  }
  0x36   : > { %p82_p0 = scmp.ne.s32.totalorder %s1193_s19, %s1189_s18  ;;  %s1729_s16 = sshll.u32 %s1221_s26, 11 }
  0x37   : > { %s1405_s14 = scalar_lea.hbm %s1699_s3, %s1729_s16  ;;  %p729_p4 = scmp.ge.s32.totalorder %s1229_s28, 1 }
  0x38   : > { %s259_s29 = scalar_lea.vmem [#allocation8], %s1348_s11  ;;  %p280_p10 = scmp.lt.s32.totalorder %s1229_s28, 5 }
  0x39   : > { %s266_s1 = sshll.u32 %s259_s29, 4  ;;  %s1415_s15 = sadd.s32 4294967295, %s1229_s28   ;;  %s1482_s1 = int_to_ptr.vmem [resolvable:$true] %s266_s1 }
  0x3a   : > { %p1410_p2 = pnand %p729_p4, %p280_p10  ;;  %s718_s17 = sadd.s32 4294967294, %s1229_s28  }
  0x3b   : > { %s36_s16 = sadd.s32 1, %s1225_s27  ;;  %s43_s11 = sadd.s32 1, %s1209_s23 }
  0x3c   : > { %s1730_s10 = scalar_select %p1410_p2, 1, 0 }
  0x3d   : > { %s1768_s16 = smov (!%p1327_p1, %s36_s16), %s1225_s27  ;;  %p50_p3 = scmp.ne.s32.totalorder %s1209_s23, %s1205_s22 }
  0x3e   : > { %p38_p5 = scmp.ge.s32.totalorder %s1768_s16, 2  ;;  %p56_p7 = scmp.ne.s32.totalorder %s1205_s22, %s1201_s21 }
  0x3f   : > { %p1731_p9 = scmp.eq.s32.totalorder %s1229_s28, 0  ;;  %p57_p12 = scmp.eq.s32.totalorder %s1415_s15, 0 }
  0x40   : > { %s1770_s16 = smov (%p38_p5, %s1768_s16), 0  ;;  %p184_p4 = scmp.eq.s32.totalorder %s1415_s15, 3 }
  0x41   : > { %p1429_p11 = por %p1731_p9, %p50_p3  ;;  %1733 = sst [smem:[#allocation19_spill]] %s1770_s16 }
  0x42   : > { %p1439_p1 = por %p57_p12, %p56_p7  ;;  %p1446_p13 = por %p82_p0, %p57_p12 }
  0x43   : > { %s40_s29 = ssub.s32 %s1225_s27, %s1770_s16  ;;  %p190_p9 = scmp.eq.s32.totalorder %s718_s17, 3 }
  0x44   : > { %s1734_s30 = scalar_select %p1439_p1, 1, 0 }
  0x45   : > { %s1735_s13 = scalar_select %p1446_p13, 1, 0 }
  0x46   : > { %p41_p10 = scmp.eq.s32.totalorder %s40_s29, 0  ;;  %p1453_p8 = por %p184_p4, %p50_p3 }
  0x47   : > { %s210_s9 = sand.u32 1, %s1209_s23   ;;  %p1464_p5 = por %p190_p9, %p56_p7 }
  0x48   : > { %s1736_s12 = scalar_select %p1453_p8, 1, 0 }
  0x49   : > { %s1459_s26 = scalar_select %p41_p10, %s1209_s23, %s43_s11  }
  0x4a   : > { %s1737_s20 = scalar_select %p1464_p5, 1, 0 }
  0x4b   : > { %s721_s18 = sshll.u32 %s210_s9, 3  ;;  %s722_s5 = sshll.u32 %s1225_s27, 7 }
  0x4c   : > { %s1472_s16 = scalar_lea.hbm %s1696_s0, %s722_s5  ;;  %s214_s17 = scalar_lea.vmem [#allocation3], %s721_s18 }
  0x4d   : > { %s221_s29 = sshll.u32 %s214_s17, 4  ;;  %p1738_p0 = scmp.lt.s32.totalorder %s1229_s28, 4  ;;  %s1484_s29 = int_to_ptr.vmem [resolvable:$true] %s221_s29 }
  0x4e   : > { %s211_s4 = scalar_lea.sflag [#allocation4], %s210_s9  ;;  %s1043_s5 = scalar_lea.hbm %s1472_s16, 128 }
  0x4f   : > { %p1478_p3 = pnand %p1738_p0, %p1429_p11  ;;  %p1044_p7 = scmp.ne.s32.totalorder %s1472_s16, %s1043_s5 }
  0x50   : > { %s1048_s18 = scalar_lea.hbm %s1696_s0, 256  ;;  %p1049_p11 = scmp.lt.u32.totalorder %s1472_s16, %s1696_s0 }
  0x51   : > { %p1045_p12 = pneg %p1478_p3  ;;  %p1050_p9 = scmp.lt.u32.totalorder %s1048_s18, %s1043_s5 }
  0x52   : > { %p1052_p5 = scmp.lt.u32.totalorder %s1043_s5, %s1472_s16 }
  0x53   : > { %p1046_p4 = pnand %p1045_p12, %p1044_p7  ;;  %p1051_p0 = por %p1050_p9, %p1049_p11 }
  0x55   : > { %p1047_p10 = pneg %p1046_p4  ;;  %p1053_p8 = por %p1052_p5, %p1051_p0 }
  0x57   : > { %p1054_p13 = pnand %p1053_p8, %p1047_p10 }
  0x59   : > { %1057 = shalt.err (!%p1054_p13)
}
  0x5a   : > { %s1058_s9 = scalar_lea.vmem %s1484_s29, 128  ;;  %s1234_s25 = smov [#allocation3]  }
  0x5b   : > { %p1059_p7 = scmp.ne.s32.totalorder %s1484_s29, %s1058_s9  ;;  %s1063_s8 = sshll.u32 %s1234_s25, 4  ;;  %s1064_s8 = int_to_ptr.vmem [resolvable:$false] %s1063_s8 }
  0x5c   : > { %s1065_s27 = scalar_lea.vmem %s1064_s8, 256  ;;  %p1066_p2 = scmp.lt.s32.totalorder %s1484_s29, %s1064_s8 }
  0x5d   : > { %p1061_p4 = pnand %p1059_p7, %p1045_p12  ;;  %p1067_p11 = scmp.lt.s32.totalorder %s1065_s27, %s1058_s9 }
  0x5f   : > { %p1062_p1 = pneg %p1061_p4  ;;  %p1068_p9 = por %p1067_p11, %p1066_p2 }
  0x61   : > { %p1069_p5 = pnand %p1068_p9, %p1062_p1 }
  0x63   : > { %1072 = shalt.err (!%p1069_p5)
}
  0x64   : > { %907 = dma.hbm_to_vmem [thread:$0]  (!%p1478_p3), %s1472_s16, 128, %s1484_s29, %s211_s4  }
  0x65   : > { %s1073_s5 = scalar_lea.hbm %s1405_s14, 2048  ;;  %p1740_p13 = pneg %p1361_p6 }
  0x66   : > { %p1074_p8 = scmp.ne.s32.totalorder %s1405_s14, %s1073_s5  ;;  %s1078_s9 = scalar_lea.hbm %s1699_s3, 4096 }
  0x67   : > { %p1079_p2 = scmp.lt.u32.totalorder %s1405_s14, %s1699_s3  ;;  %p1080_p1 = scmp.lt.u32.totalorder %s1078_s9, %s1073_s5 }
  0x68   : > { %p1076_p12 = pnand %p1074_p8, %p1740_p13  ;;  %p1082_p7 = scmp.lt.u32.totalorder %s1073_s5, %s1405_s14 }
  0x69   : > { %p1081_p0 = por %p1080_p1, %p1079_p2 }
  0x6a   : > { %p1077_p10 = pneg %p1076_p12 }
  0x6b   : > { %p1083_p4 = por %p1082_p7, %p1081_p0 }
  0x6d   : > { %p1084_p11 = pnand %p1083_p4, %p1077_p10 }
  0x6f   : > { %1087 = shalt.err (!%p1084_p11)
}
  0x70   : > { %s1088_s16 = scalar_lea.vmem %s1482_s1, 2048  ;;  %p1741_p9 = pmov %p1740_p13 }
  0x71   : > { %p1089_p3 = scmp.ne.s32.totalorder %s1482_s1, %s1088_s16  ;;  %s1235_s29 = smov [#allocation8]  }
  0x72   : > { %s1093_s4 = sshll.u32 %s1235_s29, 4  ;;  %s1094_s4 = int_to_ptr.vmem [resolvable:$false] %s1093_s4 }
  0x73   : > { %p1091_p5 = pnand %p1089_p3, %p1741_p9  ;;  %s1095_s8 = scalar_lea.vmem %s1094_s4, 4096 }
  0x74   : > { %p1096_p13 = scmp.lt.s32.totalorder %s1482_s1, %s1094_s4  ;;  %p1097_p12 = scmp.lt.s32.totalorder %s1095_s8, %s1088_s16 }
  0x75   : > { %p1092_p8 = pneg %p1091_p5 }
  0x76   : > { %p1098_p2 = por %p1097_p12, %p1096_p13 }
  0x78   : > { %p1099_p1 = pnand %p1098_p2, %p1092_p8 }
  0x7a   : > { %1102 = shalt.err (!%p1099_p1)
}
  0x7b   : > { %s1742_s27 = smov 8   ;;  %s1743_s5 = smov 128  }
  0x7c   : > { %913 = dma.hbm_to_vmem [thread:$0]  (!%p1361_p6), %s1405_s14, 2048, %s1482_s1, %s1367_s7, %s1743_s5, %s1743_s5, %s1742_s27  }
  0x7d   : > { %p1744_p10 = scmp.ne.s32.totalorder %s1730_s10, 0 }
  0x7e   : > { %s1541_s18 = sand.u32 (!%p1744_p10), 1, %s1205_s22   ;;  %p1745_p0 = scmp.ne.s32.totalorder (!%p1744_p10), %s1734_s30, 0 }
  0x7f   : > { %284 = sbr.rel (%p1744_p10) target bundleno = 654 (0x28e), region = 40  ;;  %s730_s17 = sshll.u32 (!%p1744_p10), %s1541_s18, 3 }
  0x80   : > { %s287_s9 = scalar_lea.sflag (!%p1744_p10), [#allocation4], %s1541_s18  ;;  %s290_s25 = scalar_lea.vmem (!%p1744_p10), [#allocation3], %s730_s17 }
  0x86   : > { %1176 = dma.done.wait (%p1745_p0), %s287_s9, 128  }
  0x87   : > { %1178 = vsyncadd (%p1745_p0), %s287_s9, 4294967168  ;;  %s295_s1 = sand.u32 1, %s1415_s15   ;;  %s297_s10 = sand.u32 1, %s1193_s19  }
  0x88   : > { %s731_s6 = sshll.u32 %s297_s10, 7  ;;  %s296_s7 = scalar_lea.sflag [#allocation7], %s295_s1 }
  0x89   : > { %s1551_s14 = scalar_lea.vmem [#allocation6], %s731_s6  ;;  %p1746_p6 = scmp.ne.s32.totalorder %s1735_s13, 0 }
  0x8b   : > { %1180 = dma.done.wait (%p1746_p6), %s296_s7, 4096  }
  0x8c   : > { %1182 = vsyncadd (%p1746_p6), %s296_s7, 4294963200  ;;  %p351_p7 = scmp.lt.s32.totalorder %s1213_s24, 1  ;;  %s1747_s8 = sld [smem:[#allocation21_spill]] }
  0x8d   : > { %s1569_s5 = scalar_lea.vmem [#allocation8], %s731_s6  ;;  %s1571_s9 = scalar_lea.vmem [#allocation9], %s730_s17 }
  0x8e   : > { %s1559_s11 = scalar_select %p351_p7, %s1213_s24, 1 }
  0x8f   : > { %p734_p4 = scmp.ne.s32.totalorder %s1213_s24, 0 }
  0x90   : > { %s353_s15 = scalar_lea.vmem %s1698_s2, %s1559_s11  ;;  %v361_v0 = vld [vmem:[%s290_s25] sm:$0xff] (!%p734_p4) }
  0x91   : > { %360 = sbr.rel (%p734_p4) target bundleno = 152 (0x98), region = 56  ;;  %362 = vst [vmem:[#allocation2] sm:$0xff] (!%p734_p4), %v361_v0 }
  0x92   : > { %s356_s27 = scalar_lea.vmem %s1747_s8, %s1559_s11 }
  0x98 PF: > { %v364_v1 = vld [vmem:[%s1551_s14] sm:$0xff]  ;;  %v365_v2 = vld [vmem:[%s1551_s14 + $0x8] sm:$0xff]  ;;  %v366_v3 = vld [vmem:[%s1551_s14 + $0x10] sm:$0xff]  ;;  %v1236_v4 = vmov 0.0|0.0   ;;  %vm1237_vm0 = vmmov 0   ;;  %v1238_v7 = vmov 0.0  }
  0x99   : > { %848 = vmatprep.subr.bf16.mxu0 %v1236_v4  ;;  %v849_v5 = vpack.c.bf16 %v365_v2, %v364_v1  ;;  %v367_v6 = vld [vmem:[%s1551_s14 + $0x18] sm:$0xff]  ;;  %810 = vmatprep.mubr.msk.f32.mxu0 %vm1237_vm0, %v1238_v7  ;;  %v368_v9 = vld [vmem:[%s1551_s14 + $0x20] sm:$0xff]  ;;  %v369_v10 = vld [vmem:[%s1551_s14 + $0x28] sm:$0xff]  ;;  %p737_p11 = scmp.ne.s32.totalorder %s1213_s24, 1 }
  0x9a   : > { %872 = vmatprep.subr.bf16.mxu1 %v1236_v4  ;;  %845 = vmatprep.mubr.msk.f32.mxu1 %vm1237_vm0, %v1238_v7  ;;  %v852_v8 = vpack.c.bf16 %v367_v6, %v366_v3  ;;  %v459_v11 = vld [vmem:[%s1569_s5] sm:$0xff]  ;;  %v460_v12 = vld [vmem:[%s1569_s5 + $0x8] sm:$0xff]  ;;  %v461_v13 = vld [vmem:[%s1569_s5 + $0x10] sm:$0xff]  ;;  %v855_v15 = vpack.c.bf16 %v369_v10, %v368_v9 }
  0x9b   : > { %850 = vmatpush3.bf16.msra.mxu0 %v849_v5  ;;  %v462_v14 = vld [vmem:[%s1569_s5 + $0x18] sm:$0xff]  ;;  %v873_v16 = vpack.c.bf16 %v460_v12, %v459_v11  ;;  %v370_v17 = vld [vmem:[%s1551_s14 + $0x30] sm:$0xff]  ;;  %v463_v20 = vld [vmem:[%s1569_s5 + $0x20] sm:$0xff] }
  0x9c   : > { %851 = vmatprep.subr.bf16.mxu0 %v1236_v4  ;;  %v371_v18 = vld [vmem:[%s1551_s14 + $0x38] sm:$0xff]  ;;  %v876_v19 = vpack.c.bf16 %v462_v14, %v461_v13  ;;  %v464_v21 = vld [vmem:[%s1569_s5 + $0x28] sm:$0xff]  ;;  %v372_v23 = vld [vmem:[%s1551_s14 + $0x40] sm:$0xff] }
  0x9d   : > { %874 = vmatpush3.bf16.msra.mxu1 %v873_v16  ;;  %v858_v22 = vpack.c.bf16 %v371_v18, %v370_v17  ;;  %v373_v24 = vld [vmem:[%s1551_s14 + $0x48] sm:$0xff]  ;;  %v879_v25 = vpack.c.bf16 %v464_v21, %v463_v20  ;;  %v465_v26 = vld [vmem:[%s1569_s5 + $0x30] sm:$0xff]  ;;  %v466_v27 = vld [vmem:[%s1569_s5 + $0x38] sm:$0xff] }
  0x9e   : > { %875 = vmatprep.subr.bf16.mxu1 %v1236_v4  ;;  %v861_v28 = vpack.c.bf16 %v373_v24, %v372_v23  ;;  %v374_v29 = vld [vmem:[%s1551_s14 + $0x50] sm:$0xff]  ;;  %v375_v30 = vld [vmem:[%s1551_s14 + $0x58] sm:$0xff]  ;;  %v882_v31 = vpack.c.bf16 %v466_v27, %v465_v26  ;;  %v467_v32 = vld [vmem:[%s1569_s5 + $0x40] sm:$0xff] }
  0x9f   : > { %853 = vmatpush3.bf16.msra.mxu0 %v852_v8  ;;  %v468_v33 = vld [vmem:[%s1569_s5 + $0x48] sm:$0xff]  ;;  %v864_v34 = vpack.c.bf16 %v375_v30, %v374_v29  ;;  %v376_v35 = vld [vmem:[%s1551_s14 + $0x60] sm:$0xff]  ;;  %v469_v38 = vld [vmem:[%s1569_s5 + $0x50] sm:$0xff] }
  0xa0   : > { %854 = vmatprep.subr.bf16.mxu0 %v1236_v4  ;;  %v377_v36 = vld [vmem:[%s1551_s14 + $0x68] sm:$0xff]  ;;  %v885_v37 = vpack.c.bf16 %v468_v33, %v467_v32  ;;  %v470_v39 = vld [vmem:[%s1569_s5 + $0x58] sm:$0xff]  ;;  %v378_v41 = vld [vmem:[%s1551_s14 + $0x70] sm:$0xff] }
  0xa1   : > { %877 = vmatpush3.bf16.msra.mxu1 %v876_v19  ;;  %v867_v40 = vpack.c.bf16 %v377_v36, %v376_v35  ;;  %v379_v42 = vld [vmem:[%s1551_s14 + $0x78] sm:$0xff]  ;;  %v888_v43 = vpack.c.bf16 %v470_v39, %v469_v38  ;;  %v471_v44 = vld [vmem:[%s1569_s5 + $0x60] sm:$0xff]  ;;  %v472_v45 = vld [vmem:[%s1569_s5 + $0x68] sm:$0xff] }
  0xa2   : > { %878 = vmatprep.subr.bf16.mxu1 %v1236_v4  ;;  %v870_v46 = vpack.c.bf16 %v379_v42, %v378_v41  ;;  %v891_v47 = vpack.c.bf16 %v472_v45, %v471_v44  ;;  %v363_v48 = vld [vmem:[#allocation2] sm:$0xff]  ;;  %v473_v49 = vld [vmem:[%s1569_s5 + $0x70] sm:$0xff]  ;;  %v474_v50 = vld [vmem:[%s1569_s5 + $0x78] sm:$0xff] }
  0xa3   : > { %856 = vmatpush3.bf16.msra.mxu0 %v855_v15  ;;  %v894_v51 = vpack.c.bf16 %v474_v50, %v473_v49  ;;  %v735_v53 = vld [vmem:[%s353_s15] ss:$0 sm:$0xff] }
  0xa4   : > { %857 = vmatprep.subr.bf16.mxu0 %v1236_v4  ;;  %v736_v58 = vld [vmem:[%s356_s27] ss:$0 sm:$0xff] }
  0xa5   : > { %880 = vmatpush3.bf16.msra.mxu1 %v879_v25 }
  0xa6   : > { %881 = vmatprep.subr.bf16.mxu1 %v1236_v4 }
  0xa7   : > { %859 = vmatpush3.bf16.msra.mxu0 %v858_v22 }
  0xa8   : > { %860 = vmatprep.subr.bf16.mxu0 %v1236_v4 }
  0xa9   : > { %883 = vmatpush3.bf16.msra.mxu1 %v882_v31 }
  0xaa   : > { %884 = vmatprep.subr.bf16.mxu1 %v1236_v4 }
  0xab   : > { %862 = vmatpush3.bf16.msra.mxu0 %v861_v28 }
  0xac   : > { %863 = vmatprep.subr.bf16.mxu0 %v1236_v4 }
  0xad   : > { %886 = vmatpush3.bf16.msra.mxu1 %v885_v37 }
  0xae   : > { %887 = vmatprep.subr.bf16.mxu1 %v1236_v4 }
  0xaf   : > { %865 = vmatpush3.bf16.msra.mxu0 %v864_v34 }
  0xb0   : > { %866 = vmatprep.subr.bf16.mxu0 %v1236_v4 }
  0xb1   : > { %889 = vmatpush3.bf16.msra.mxu1 %v888_v43 }
  0xb2   : > { %890 = vmatprep.subr.bf16.mxu1 %v1236_v4 }
  0xb3   : > { %868 = vmatpush3.bf16.msra.mxu0 %v867_v40 }
  0xb4   : > { %869 = vmatprep.subr.bf16.mxu0 %v1236_v4 }
  0xb5   : > { %892 = vmatpush3.bf16.msra.mxu1 %v891_v47 }
  0xb6   : > { %893 = vmatprep.subr.bf16.mxu1 %v1236_v4 }
  0xb7   : > { %871 = vmatpush3.bf16.msra.mxu0 %v870_v46 }
  0xb9   : > { %895 = vmatpush3.bf16.msra.mxu1 %v894_v51 }
  0xba   : > { %811 = vmatmul.mubr.f32.vlgmr.msra.gmra.mrb[0].mxu0 %v363_v48 }
 0x18d   : > { %v446_v52 = vpop.f32.mrb[0].mxu0 }
 0x18e   : > { %v450_v54 = vadd.f32 %v446_v52, %v363_v48  ;;  %v812_v55 = vpop.f32.mrb[1].mxu0 }
 0x190   : > { %v458_v56 = vadd.f32 %v735_v53, %v450_v54 }
 0x192   : > { %846 = vmatmul.mubr.f32.vlgmr.msra.gmra.mrb[0].mxu1 %v458_v56 }
 0x264   : > { %558 = sbr.rel (%p737_p11) target bundleno = 627 (0x273), region = 60 }
 0x265   : > { %v541_v57 = vpop.f32.mrb[0].mxu1 }
 0x266   : > { %v545_v59 = vadd.f32 %v541_v57, %v458_v56  ;;  %v847_v60 = vpop.f32.mrb[1].mxu1 }
 0x268   : > { %v553_v61 = vadd.f32 %v736_v58, %v545_v59 }
 0x26a   : > { %554 = vst [vmem:[#allocation2] sm:$0xff] %v553_v61 }
 0x271   : > { %v559_v62 = vld [vmem:[#allocation2] sm:$0xff] }
 0x272   : > { %560 = vst [vmem:[%s1571_s9] sm:$0xff] %v559_v62 }
 0x273 PF: > { %s1749_s6 = sld [smem:[#allocation14_spill]]  ;;  %s1750_s11 = sld [smem:[#allocation22_spill]] }
 0x274   : > { %s575_s15 = sshll.u32 %s1571_s9, 4  ;;  %s562_s29 = scalar_lea.sflag [#allocation5], %s1541_s18  ;;  %s576_s15 = int_to_ptr.vmem [resolvable:$true] %s575_s15 }
 0x275   : > { %s1103_s4 = scalar_lea.vmem %s576_s15, 128  ;;  %p1751_p9 = scmp.ne.s32.totalorder %s1736_s12, 0 }
 0x276   : > { %p1104_p3 = scmp.ne.s32.totalorder %s576_s15, %s1103_s4  ;;  %s1239_s24 = smov [#allocation9]  }
 0x277   : > { %s1107_s8 = sshll.u32 %s1239_s24, 4  ;;  %s1108_s8 = int_to_ptr.vmem [resolvable:$false] %s1107_s8 }
 0x278   : > { %p1105_p5 = pnand %p1104_p3, %p1751_p9  ;;  %s1109_s27 = scalar_lea.vmem %s1108_s8, 256 }
 0x279   : > { %s739_s7 = sshll.u32 %s1749_s6, 7  ;;  %p1110_p13 = scmp.lt.s32.totalorder %s576_s15, %s1108_s8 }
 0x27a   : > { %s1638_s16 = scalar_lea.hbm %s1750_s11, %s739_s7  ;;  %p1106_p8 = pneg %p1105_p5 }
 0x27b   : > { %p1111_p12 = scmp.lt.s32.totalorder %s1109_s27, %s1103_s4 }
 0x27d   : > { %p1112_p2 = por %p1111_p12, %p1110_p13 }
 0x27f   : > { %p1113_p1 = pnand %p1112_p2, %p1106_p8 }
 0x281   : > { %1116 = shalt.err (!%p1113_p1)
}
 0x282   : > { %s1117_s18 = scalar_lea.hbm %s1638_s16, 128  ;;  %s1121_s13 = scalar_lea.hbm %s1750_s11, 256 }
 0x283   : > { %p1118_p10 = scmp.ne.s32.totalorder %s1638_s16, %s1117_s18  ;;  %p1122_p7 = scmp.lt.u32.totalorder %s1638_s16, %s1750_s11 }
 0x284   : > { %p1123_p4 = scmp.lt.u32.totalorder %s1121_s13, %s1117_s18  ;;  %p1125_p3 = scmp.lt.u32.totalorder %s1117_s18, %s1638_s16 }
 0x285   : > { %p1119_p0 = pnand %p1118_p10, %p1751_p9 }
 0x286   : > { %p1124_p11 = por %p1123_p4, %p1122_p7 }
 0x287   : > { %p1120_p6 = pneg %p1119_p0 }
 0x288   : > { %p1126_p5 = por %p1125_p3, %p1124_p11 }
 0x28a   : > { %p1127_p8 = pnand %p1126_p5, %p1120_p6 }
 0x28c   : > { %1130 = shalt.err (!%p1127_p8)
}
 0x28d   : > { %902 = dma.vmem_to_hbm [thread:$0]  (%p1751_p9), %s576_s15, 128, %s1638_s16, %s562_s29  }
 0x28e PF: > { %p919_p13 = scmp.ge.s32.totalorder %s1229_s28, 2  ;;  %s587_s1 = sand.u32 1, %s1201_s21  }
 0x28f   : > { %p1752_p12 = scmp.ne.s32.totalorder %s1737_s20, 0  ;;  %s588_s10 = scalar_lea.sflag [#allocation5], %s587_s1 }
 0x291   : > { %p915_p2 = pnand %p919_p13, %p1752_p12 }
 0x293   : > { %1184 = dma.done.wait (!%p915_p2), %s588_s10, 128  }
 0x294   : > { %1186 = vsyncadd (!%p915_p2), %s588_s10, 4294967168  ;;  %s24_s28 = sadd.s32 1, %s1229_s28   ;;  %s1753_s6 = sld [smem:[#allocation13_spill]] }
 0x295   : > { %p21_p1 = scmp.ge.s32.totalorder %s24_s28, 6   ;;  %s1754_s20 = sld [smem:[#allocation18_spill]] }
 0x296   : > { %s1755_s24 = sld [smem:[#allocation15_spill]]  ;;  %s1756_s25 = sld [smem:[#allocation16_spill]] }
 0x297   : > { %s1757_s12 = sld [smem:[#allocation17_spill]]  ;;  %s1758_s27 = sld [smem:[#allocation19_spill]] }
 0x298   : > { %s1759_s18 = smov %s1193_s19  ;;  %s1761_s21 = smov %s1205_s22 }
 0x299   : > { %s1762_s22 = smov %s1209_s23  ;;  %s1763_s23 = smov %s1459_s26 }
 0x29a   : > { %s1760_s19 = smov %s1753_s6  ;;  %23 = sbr.rel (!%p21_p1) target bundleno = 15 (0xf), region = 123 }
 0x29d   : > { %s1764_s26 = smov %s1757_s12 }
 0x2a1   :  { %593 = vsyncpa [#allocation4], 1 }
 0x2a2   :  { %595 = vsyncpa [#allocation4 + $0x1], 1 }
 0x2a3   :  { %596 = vsyncpa [#allocation7], 1 }
 0x2a4   :  { %598 = vsyncpa [#allocation7 + $0x1], 1 }
 0x2a5   :  { %599 = vsyncpa [#allocation5], 1 }
 0x2a6   :  { %601 = vsyncpa [#allocation5 + $0x1], 1 }

</bundles_post_ra>
